<compile_context>
chip_gen: v5e
topology: v5e:2x2
jax: 0.10.0
libtpu: 0.0.40
codegen_flags: <defaults>
</compile_context>

<pallas_src>
import functools

import jax
import jax.numpy as jnp
from jax.experimental import pallas as pl
from jax.experimental.pallas import tpu as pltpu

H1, H2 = 400, 300  # hidden widths fixed by the PyTorch module


def _round_up(x, m):
    return (x + m - 1) // m * m


def _actor_kernel(x_ref, w1_ref, w2_ref, w3_ref, b_ref, o_ref, *,
                  max_action, h1p, h2p):
    # Fused bias vector: [b1 | b2 | b3], f32, static lane-aligned slices.
    b1 = b_ref[:, :h1p]
    b2 = b_ref[:, h1p:h1p + h2p]
    b3 = b_ref[:, h1p + h2p:]

    # Layer 1: bf16 MXU matmul with f32 accumulate; bias + ReLU in f32 (VPU).
    h1 = jnp.dot(x_ref[...], w1_ref[...], preferred_element_type=jnp.float32)
    h1 = jnp.maximum(h1 + b1, 0.0)

    # Layer 2: cast activation back to bf16 only for the MXU input.
    h2 = jnp.dot(h1.astype(w2_ref.dtype), w2_ref[...],
                 preferred_element_type=jnp.float32)
    h2 = jnp.maximum(h2 + b2, 0.0)

    # Layer 3 + tanh (EUP slot) + max_action scale (VALU slot), all hidden
    # under the MXU/DMA work; do NOT hoist the scale into the wrapper.
    o = jnp.dot(h2.astype(w3_ref.dtype), w3_ref[...],
                preferred_element_type=jnp.float32)
    o = jnp.tanh(o + b3) * max_action
    o_ref[...] = o.astype(o_ref.dtype)


def pad_actor_params(params, compute_dtype=jnp.bfloat16):
    """Pad + transpose-free pack of the Actor params. Call ONCE, reuse forever."""
    w1, b1 = params["w1"], params["b1"]     # (S, 400), (400,)
    w2, b2 = params["w2"], params["b2"]     # (400, 300), (300,)
    w3, b3 = params["w3"], params["b3"]     # (300, A), (A,)

    S = w1.shape[0]
    A = w3.shape[1]
    Sp = _round_up(S, 128)
    H1p = _round_up(H1, 128)
    H2p = _round_up(H2, 128)
    Ap = _round_up(A, 128)

    w1p = jnp.zeros((Sp, H1p), compute_dtype).at[:S, :H1].set(
        w1.astype(compute_dtype))
    w2p = jnp.zeros((H1p, H2p), compute_dtype).at[:H1, :H2].set(
        w2.astype(compute_dtype))
    w3p = jnp.zeros((H2p, Ap), compute_dtype).at[:H2, :A].set(
        w3.astype(compute_dtype))

    # Biases stay f32 (they add onto the f32 accumulator) and are fused into
    # one row vector to cut the number of tiny input DMAs.
    bcat = jnp.zeros((1, H1p + H2p + Ap), jnp.float32)
    bcat = bcat.at[0, :H1].set(b1)
    bcat = bcat.at[0, H1p:H1p + H2].set(b2)
    bcat = bcat.at[0, H1p + H2p:H1p + H2p + A].set(b3)

    return {"w1": w1p, "w2": w2p, "w3": w3p, "b": bcat,
            "dims": (S, A, Sp, H1p, H2p, Ap)}


def actor_forward(x, padded_params, max_action, *, block_b=128):
    """x: (B, state_dim) f32. padded_params: output of pad_actor_params."""
    S, A, Sp, H1p, H2p, Ap = padded_params["dims"]
    B = x.shape[0]
    compute_dtype = padded_params["w1"].dtype

    # Batch tile: 128 rows fills the MXU M dimension; small batches just use
    # a single sublane-aligned tile.
    TB = block_b if B >= block_b else _round_up(max(B, 1), 8)
    Bp = _round_up(B, TB)

    # Only x is padded per call (cheap); weights were padded once at init.
    xp = jnp.zeros((Bp, Sp), compute_dtype).at[:B, :S].set(
        x.astype(compute_dtype))

    kernel = functools.partial(_actor_kernel, max_action=max_action,
                               h1p=H1p, h2p=H2p)

    out = pl.pallas_call(
        kernel,
        out_shape=jax.ShapeDtypeStruct((Bp, Ap), jnp.float32),
        grid=(Bp // TB,),
        in_specs=[
            pl.BlockSpec((TB, Sp), lambda i: (i, 0)),             # x: batch-tiled
            pl.BlockSpec((Sp, H1p), lambda i: (0, 0)),            # weights resident
            pl.BlockSpec((H1p, H2p), lambda i: (0, 0)),
            pl.BlockSpec((H2p, Ap), lambda i: (0, 0)),
            pl.BlockSpec((1, H1p + H2p + Ap), lambda i: (0, 0)),  # fused biases
        ],
        out_specs=pl.BlockSpec((TB, Ap), lambda i: (i, 0)),
        compiler_params=pltpu.CompilerParams(
            dimension_semantics=("parallel",)),
    )(xp, padded_params["w1"], padded_params["w2"], padded_params["w3"],
      padded_params["b"])

    return out[:B, :A]


def init_actor_params(key, state_dim, action_dim):
    """Deterministic init mimicking PyTorch nn.Linear default (U[-1/sqrt(fan_in), +])."""
    def linear(key, fan_in, fan_out):
        kw, kb = jax.random.split(key)
        bound = 1.0 / jnp.sqrt(fan_in)
        w = jax.random.uniform(kw, (fan_in, fan_out), jnp.float32, -bound, bound)
        b = jax.random.uniform(kb, (fan_out,), jnp.float32, -bound, bound)
        return w, b

    k1, k2, k3 = jax.random.split(key, 3)
    w1, b1 = linear(k1, state_dim, H1)
    w2, b2 = linear(k2, H1, H2)
    w3, b3 = linear(k3, H2, action_dim)
    return {"w1": w1, "b1": b1, "w2": w2, "b2": b2, "w3": w3, "b3": b3}


def actor_reference(x, params, max_action):
    h1 = jnp.maximum(x @ params["w1"] + params["b1"], 0.0)
    h2 = jnp.maximum(h1 @ params["w2"] + params["b2"], 0.0)
    return jnp.tanh(h2 @ params["w3"] + params["b3"]) * max_action


if __name__ == "__main__":
    # Pendulum-v1: state_dim=3, action_dim=1, max_action=2.0
    state_dim, action_dim, max_action = 3, 1, 2.0
    batch = 4

    key = jax.random.PRNGKey(0)
    kp, kx = jax.random.split(key)
    params = init_actor_params(kp, state_dim, action_dim)
    padded = pad_actor_params(params)          # done once, reused every call
    x = jax.random.normal(kx, (batch, state_dim), jnp.float32)

    out = actor_forward(x, padded, max_action)
    out = jax.block_until_ready(out)

    ref = actor_reference(x, params, max_action)
    assert out.shape == (batch, action_dim), out.shape
    # bf16 matmuls (f32 accumulate) -> loosen tolerance vs the f32 reference.
    assert jnp.allclose(out, ref, atol=3e-2, rtol=3e-2), (out, ref)

    # Also exercise the multi-tile (grid > 1) path with a larger batch.
    xb = jax.random.normal(jax.random.PRNGKey(1), (300, state_dim), jnp.float32)
    outb = jax.block_until_ready(actor_forward(xb, padded, max_action))
    refb = actor_reference(xb, params, max_action)
    assert outb.shape == (300, action_dim), outb.shape
    assert jnp.allclose(outb, refb, atol=3e-2, rtol=3e-2)

    print("KERNEL_OK")
</pallas_src>

<mosaic_0001>
module attributes {stable_mosaic.version = 11 : i64} {
  func.func @_actor_kernel(%arg0: i32, %arg1: memref<8x128xbf16, #tpu.memory_space<vmem>>, %arg2: memref<128x512xbf16, #tpu.memory_space<vmem>>, %arg3: memref<512x384xbf16, #tpu.memory_space<vmem>>, %arg4: memref<384x128xbf16, #tpu.memory_space<vmem>>, %arg5: memref<1x1024xf32, #tpu.memory_space<vmem>>, %arg6: memref<8x128xf32, #tpu.memory_space<vmem>>) attributes {dimension_semantics = [#tpu.dimension_semantics<parallel>], iteration_bounds = array<i64: 1>, scalar_prefetch = 0 : i64, scratch_operands = 0 : i64, tpu.core_type = #tpu.core_type<tc>, window_params = [{transform_indices = @transform_0, window_bounds = array<i64: 8, 128>}, {pipeline_mode = #tpu.pipeline_mode<synchronous>, transform_indices = @transform_1, window_bounds = array<i64: 128, 512>}, {pipeline_mode = #tpu.pipeline_mode<synchronous>, transform_indices = @transform_2, window_bounds = array<i64: 512, 384>}, {pipeline_mode = #tpu.pipeline_mode<synchronous>, transform_indices = @transform_3, window_bounds = array<i64: 384, 128>}, {pipeline_mode = #tpu.pipeline_mode<synchronous>, transform_indices = @transform_4, window_bounds = array<i64: 1, 1024>}, {transform_indices = @transform_5, window_bounds = array<i64: 8, 128>}]} {
    %c0 = arith.constant 0 : index
    %c0_0 = arith.constant 0 : index
    %0 = vector.load %arg5[%c0, %c0_0] : memref<1x1024xf32, #tpu.memory_space<vmem>>, vector<1x512xf32>
    %c0_1 = arith.constant 0 : index
    %c512 = arith.constant 512 : index
    %1 = vector.load %arg5[%c0_1, %c512] : memref<1x1024xf32, #tpu.memory_space<vmem>>, vector<1x384xf32>
    %c0_2 = arith.constant 0 : index
    %c896 = arith.constant 896 : index
    %2 = vector.load %arg5[%c0_2, %c896] : memref<1x1024xf32, #tpu.memory_space<vmem>>, vector<1x128xf32>
    %c0_3 = arith.constant 0 : index
    %c0_4 = arith.constant 0 : index
    %3 = vector.load %arg1[%c0_3, %c0_4] : memref<8x128xbf16, #tpu.memory_space<vmem>>, vector<8x128xbf16>
    %c0_5 = arith.constant 0 : index
    %c0_6 = arith.constant 0 : index
    %4 = vector.load %arg2[%c0_5, %c0_6] : memref<128x512xbf16, #tpu.memory_space<vmem>>, vector<128x512xbf16>
    %cst = arith.constant dense<0.000000e+00> : vector<8x512xf32>
    %5 = tpu.matmul %3, %4, %cst {dimension_numbers = #tpu.dot_dimension_numbers<[1], [0], [0], [1], [0, 0, 1, 1], [], []>} : vector<8x128xbf16>, vector<128x512xbf16>, vector<8x512xf32> -> vector<8x512xf32>
    %6 = vector.broadcast %0 : vector<1x512xf32> to vector<8x512xf32>
    %7 = arith.addf %5, %6 : vector<8x512xf32>
    %cst_7 = arith.constant 0.000000e+00 : f32
    %8 = vector.broadcast %cst_7 : f32 to vector<8x512xf32>
    %9 = arith.maximumf %7, %8 : vector<8x512xf32>
    %10 = arith.truncf %9 : vector<8x512xf32> to vector<8x512xbf16>
    %c0_8 = arith.constant 0 : index
    %c0_9 = arith.constant 0 : index
    %11 = vector.load %arg3[%c0_8, %c0_9] : memref<512x384xbf16, #tpu.memory_space<vmem>>, vector<512x384xbf16>
    %cst_10 = arith.constant dense<0.000000e+00> : vector<8x384xf32>
    %12 = tpu.matmul %10, %11, %cst_10 {dimension_numbers = #tpu.dot_dimension_numbers<[1], [0], [0], [1], [0, 0, 1, 1], [], []>} : vector<8x512xbf16>, vector<512x384xbf16>, vector<8x384xf32> -> vector<8x384xf32>
    %13 = vector.broadcast %1 : vector<1x384xf32> to vector<8x384xf32>
    %14 = arith.addf %12, %13 : vector<8x384xf32>
    %cst_11 = arith.constant 0.000000e+00 : f32
    %15 = vector.broadcast %cst_11 : f32 to vector<8x384xf32>
    %16 = arith.maximumf %14, %15 : vector<8x384xf32>
    %17 = arith.truncf %16 : vector<8x384xf32> to vector<8x384xbf16>
    %c0_12 = arith.constant 0 : index
    %c0_13 = arith.constant 0 : index
    %18 = vector.load %arg4[%c0_12, %c0_13] : memref<384x128xbf16, #tpu.memory_space<vmem>>, vector<384x128xbf16>
    %cst_14 = arith.constant dense<0.000000e+00> : vector<8x128xf32>
    %19 = tpu.matmul %17, %18, %cst_14 {dimension_numbers = #tpu.dot_dimension_numbers<[1], [0], [0], [1], [0, 0, 1, 1], [], []>} : vector<8x384xbf16>, vector<384x128xbf16>, vector<8x128xf32> -> vector<8x128xf32>
    %20 = vector.broadcast %2 : vector<1x128xf32> to vector<8x128xf32>
    %21 = arith.addf %19, %20 : vector<8x128xf32>
    %22 = math.tanh %21 : vector<8x128xf32>
    %cst_15 = arith.constant 2.000000e+00 : f32
    %23 = vector.broadcast %cst_15 : f32 to vector<8x128xf32>
    %24 = arith.mulf %22, %23 : vector<8x128xf32>
    %c0_16 = arith.constant 0 : index
    %c0_17 = arith.constant 0 : index
    %25 = vector.load %arg6[%c0_16, %c0_17] : memref<8x128xf32, #tpu.memory_space<vmem>>, vector<8x128xf32>
    tpu.vector_store %arg6[%c0_16, %c0_17], %24 {strides = array<i32>} : memref<8x128xf32, #tpu.memory_space<vmem>>, vector<8x128xf32>,
    return
  }
  func.func @transform_0(%arg0: i32) -> (i32, i32) {
    %c0_i32 = arith.constant 0 : i32
    %c0_i32_0 = arith.constant 0 : i32
    return %arg0, %c0_i32 : i32, i32
  }
  func.func @transform_1(%arg0: i32) -> (i32, i32) {
    %c0_i32 = arith.constant 0 : i32
    %c0_i32_0 = arith.constant 0 : i32
    %c0_i32_1 = arith.constant 0 : i32
    return %c0_i32, %c0_i32_0 : i32, i32
  }
  func.func @transform_2(%arg0: i32) -> (i32, i32) {
    %c0_i32 = arith.constant 0 : i32
    %c0_i32_0 = arith.constant 0 : i32
    %c0_i32_1 = arith.constant 0 : i32
    return %c0_i32, %c0_i32_0 : i32, i32
  }
  func.func @transform_3(%arg0: i32) -> (i32, i32) {
    %c0_i32 = arith.constant 0 : i32
    %c0_i32_0 = arith.constant 0 : i32
    %c0_i32_1 = arith.constant 0 : i32
    return %c0_i32, %c0_i32_0 : i32, i32
  }
  func.func @transform_4(%arg0: i32) -> (i32, i32) {
    %c0_i32 = arith.constant 0 : i32
    %c0_i32_0 = arith.constant 0 : i32
    %c0_i32_1 = arith.constant 0 : i32
    return %c0_i32, %c0_i32_0 : i32, i32
  }
  func.func @transform_5(%arg0: i32) -> (i32, i32) {
    %c0_i32 = arith.constant 0 : i32
    %c0_i32_0 = arith.constant 0 : i32
    return %arg0, %c0_i32 : i32, i32
  }
}

</mosaic_0001>

<bundles_post_ra>
// kernel: tpu_custom_call.1
= control target key start
LH: loop header
LB: loop body
LE: loop exit
PB: predicated region body
PF: predicated region fallthrough
CT: control target
= control target key end

     0   :  { %10 = vsyncpa [#allocation3], 0  ;;  %s2432_s0 = inlined_call_operand.hbm [shape: bf16[8,128], index: 0, kind: input, shape index: {}]   ;;  %s2433_s1 = inlined_call_operand.hbm [shape: bf16[128,512], index: 1, kind: input, shape index: {}]   ;;  %s2434_s2 = inlined_call_operand.hbm [shape: bf16[512,384], index: 2, kind: input, shape index: {}]   ;;  %s2435_s3 = inlined_call_operand.hbm [shape: bf16[384,128], index: 3, kind: input, shape index: {}]   ;;  %s2436_s4 = inlined_call_operand.hbm [shape: f32[1,1024], index: 4, kind: input, shape index: {}]   ;;  %s2437_s5 = inlined_call_operand.hbm [shape: f32[8,128], index: 5, kind: output, shape index: {}]  }
   0x1   :  { %11 = vsyncpa [#allocation6], 0 }
   0x2   :  { %12 = vsyncpa [#allocation9], 0  ;;  %s29_s20 = sshll.u32 %s2433_s1, 4  ;;  %s30_s20 = int_to_ptr.hbm [resolvable:$true] %s29_s20 }
   0x3   :  { %13 = vsyncpa [#allocation4], 0  ;;  %s2352_s21 = smov [#allocation5]   ;;  %s55_s25 = sshll.u32 %s2435_s3, 4  ;;  %s56_s25 = int_to_ptr.hbm [resolvable:$true] %s55_s25 }
   0x4   :  { %s31_s22 = sshll.u32 %s2352_s21, 4  ;;  %s2353_s26 = smov 256   ;;  %s32_s22 = int_to_ptr.vmem [resolvable:$true] %s31_s22 }
   0x5   :  { %s2354_s27 = smov 16   ;;  %s2355_s28 = smov [#allocation8]  }
   0x6   :  { %37 = dma.hbm_to_vmem [thread:$0]  %s30_s20, 4096, %s32_s22, [#allocation6], %s2353_s26, %s2353_s26, %s2354_s27  }
   0x7   :  { %s57_s29 = sshll.u32 %s2355_s28, 4  ;;  %s2356_s30 = smov 64   ;;  %s58_s29 = int_to_ptr.vmem [resolvable:$true] %s57_s29 }
   0x8   :  { %s2357_s6 = smov 4   ;;  %s19_s8 = sshll.u32 %s2432_s0, 4  ;;  %s20_s8 = int_to_ptr.hbm [resolvable:$true] %s19_s8 }
   0x9   :  { %63 = dma.hbm_to_vmem [thread:$0]  %s56_s25, 3072, %s58_s29, [#allocation9], %s2356_s30, %s2356_s30, %s2357_s6  }
   0xa   :  { %s2358_s9 = smov [#allocation2]   ;;  %s42_s12 = sshll.u32 %s2434_s2, 4  ;;  %s43_s12 = int_to_ptr.hbm [resolvable:$true] %s42_s12 }
   0xb   :  { %s21_s10 = sshll.u32 %s2358_s9, 4  ;;  %s2359_s13 = smov [#allocation7]   ;;  %s22_s10 = int_to_ptr.vmem [resolvable:$true] %s21_s10 }
   0xc   :  { %24 = dma.hbm_to_vmem [thread:$0]  %s20_s8, 64, %s22_s10, [#allocation3]  }
   0xd   :  { %s44_s14 = sshll.u32 %s2359_s13, 4  ;;  %s2360_s15 = smov 192   ;;  %s45_s14 = int_to_ptr.vmem [resolvable:$true] %s44_s14 }
   0xe   :  { %s2361_s16 = smov 12   ;;  %s69_s0 = sshll.u32 %s2436_s4, 4  ;;  %s70_s0 = int_to_ptr.hbm [resolvable:$true] %s69_s0 }
   0xf   :  { %50 = dma.hbm_to_vmem [thread:$0]  %s43_s12, 12288, %s45_s14, [#allocation6], %s2360_s15, %s2360_s15, %s2361_s16  }
  0x10   :  { %s2362_s19 = smov [#allocation10]  }
  0x11   :  { %s71_s20 = sshll.u32 %s2362_s19, 4  ;;  %s72_s20 = int_to_ptr.vmem [resolvable:$true] %s71_s20 }
  0x12   :  { %74 = dma.hbm_to_vmem [thread:$0]  %s70_s0, 128, %s72_s20, [#allocation9]  }
  0x13   :  { %2344 = dma.done.wait [#allocation3], 64  }
  0x14   :  { %2345 = vsyncadd [#allocation3], 4294967232 }
  0x15   :  { %2346 = dma.done.wait [#allocation6], 16384  }
  0x16   :  { %2347 = vsyncadd [#allocation6], 4294950912 }
  0x17   :  { %2348 = dma.done.wait [#allocation9], 3200  }
  0x18   :  { %2349 = vsyncadd [#allocation9], 4294964096  ;;  %v1539_v0 = vld [vmem:[#allocation5 + $0xe0] sm:$0xf]  ;;  %v2063_v1 = vld [vmem:[#allocation5 + $0xec] sm:$0xf0] }
  0x19   :  { %v2061_v2 = vld [vmem:[#allocation5 + $0xe4] sm:$0xf]  ;;  %v1540_v3 = vor.u32 %v2063_v1, %v1539_v0  ;;  %v1541_v4 = vld [vmem:[#allocation5 + $0xf0] sm:$0xf0]  ;;  %v1547_v5 = vld [vmem:[#allocation5 + $0xe8] sm:$0xf] }
  0x1a   :  { %v2064_v6 = vld [vmem:[#allocation5 + $0xf4] sm:$0xf0]  ;;  %v1544_v7 = vor.u32 %v2061_v2, %v1541_v4  ;;  %v2062_v9 = vld [vmem:[#allocation5 + $0xec] sm:$0xf]  ;;  %v1549_v10 = vld [vmem:[#allocation5 + $0xf8] sm:$0xf0] }
  0x1b   :  { %v1548_v8 = vor.u32 %v2064_v6, %v1547_v5  ;;  %v1523_v11 = vld [vmem:[#allocation5 + $0xc0] sm:$0xf]  ;;  %300 = vmatpush.bf16.msra.mxu0 %v1540_v3  ;;  %v1552_v12 = vor.u32 %v2062_v9, %v1549_v10  ;;  %v2059_v13 = vld [vmem:[#allocation5 + $0xcc] sm:$0xf0]  ;;  %v2057_v14 = vld [vmem:[#allocation5 + $0xc4] sm:$0xf] }
  0x1c   :  { %v1525_v15 = vld [vmem:[#allocation5 + $0xd0] sm:$0xf0]  ;;  %313 = vmatpush.bf16.msra.mxu1 %v1544_v7  ;;  %v1524_v16 = vor.u32 %v2059_v13, %v1523_v11  ;;  %v1531_v18 = vld [vmem:[#allocation5 + $0xc8] sm:$0xf]  ;;  %v2060_v19 = vld [vmem:[#allocation5 + $0xd4] sm:$0xf0] }
  0x1d   :  { %326 = vmatpush.bf16.msra.mxu2 %v1548_v8  ;;  %v1528_v17 = vor.u32 %v2057_v14, %v1525_v15  ;;  %v2058_v20 = vld [vmem:[#allocation5 + $0xcc] sm:$0xf]  ;;  %339 = vmatpush.bf16.msra.mxu3 %v1552_v12  ;;  %v1532_v21 = vor.u32 %v2060_v19, %v1531_v18  ;;  %v1533_v22 = vld [vmem:[#allocation5 + $0xd8] sm:$0xf0]  ;;  %v1507_v23 = vld [vmem:[#allocation5 + $0xa0] sm:$0xf] }
  0x1e   :  { %v2055_v24 = vld [vmem:[#allocation5 + $0xac] sm:$0xf0]  ;;  %v1536_v25 = vor.u32 %v2058_v20, %v1533_v22  ;;  %v2053_v26 = vld [vmem:[#allocation5 + $0xa4] sm:$0xf]  ;;  %v1509_v27 = vld [vmem:[#allocation5 + $0xb0] sm:$0xf0] }
  0x1f   :  { %v1515_v28 = vld [vmem:[#allocation5 + $0xa8] sm:$0xf]  ;;  %301 = vmatpush.bf16.msra.mxu0 %v1524_v16  ;;  %v1508_v29 = vor.u32 %v2055_v24, %v1507_v23  ;;  %v2056_v30 = vld [vmem:[#allocation5 + $0xb4] sm:$0xf0]  ;;  %v2054_v31 = vld [vmem:[#allocation5 + $0xac] sm:$0xf]  ;;  %v1512_v33 = vor.u32 %v2053_v26, %v1509_v27 }
  0x20   :  { %v1517_v32 = vld [vmem:[#allocation5 + $0xb8] sm:$0xf0]  ;;  %314 = vmatpush.bf16.msra.mxu1 %v1528_v17  ;;  %v1516_v34 = vor.u32 %v2056_v30, %v1515_v28  ;;  %v1491_v35 = vld [vmem:[#allocation5 + $0x80] sm:$0xf]  ;;  %v2051_v36 = vld [vmem:[#allocation5 + $0x8c] sm:$0xf0] }
  0x21   :  { %327 = vmatpush.bf16.msra.mxu2 %v1532_v21  ;;  %v2049_v37 = vld [vmem:[#allocation5 + $0x84] sm:$0xf]  ;;  %340 = vmatpush.bf16.msra.mxu3 %v1536_v25  ;;  %v1520_v38 = vor.u32 %v2054_v31, %v1517_v32  ;;  %v1493_v39 = vld [vmem:[#allocation5 + $0x90] sm:$0xf0]  ;;  %v1499_v40 = vld [vmem:[#allocation5 + $0x88] sm:$0xf]  ;;  %v1492_v44 = vor.u32 %v2051_v36, %v1491_v35 }
  0x22   :  { %v2052_v41 = vld [vmem:[#allocation5 + $0x94] sm:$0xf0]  ;;  %v2050_v42 = vld [vmem:[#allocation5 + $0x8c] sm:$0xf]  ;;  %v1501_v43 = vld [vmem:[#allocation5 + $0x98] sm:$0xf0]  ;;  %v1496_v45 = vor.u32 %v2049_v37, %v1493_v39 }
  0x23   :  { %302 = vmatpush.bf16.msra.mxu0 %v1508_v29  ;;  %v1500_v46 = vor.u32 %v2052_v41, %v1499_v40  ;;  %v1475_v47 = vld [vmem:[#allocation5 + $0x60] sm:$0xf]  ;;  %v2047_v48 = vld [vmem:[#allocation5 + $0x6c] sm:$0xf0]  ;;  %v2045_v49 = vld [vmem:[#allocation5 + $0x64] sm:$0xf]  ;;  %v1504_v50 = vor.u32 %v2050_v42, %v1501_v43 }
  0x24   :  { %315 = vmatpush.bf16.msra.mxu1 %v1512_v33  ;;  %v1477_v51 = vld [vmem:[#allocation5 + $0x70] sm:$0xf0]  ;;  %v1483_v52 = vld [vmem:[#allocation5 + $0x68] sm:$0xf]  ;;  %v2048_v53 = vld [vmem:[#allocation5 + $0x74] sm:$0xf0]  ;;  %v1476_v56 = vor.u32 %v2047_v48, %v1475_v47 }
  0x25   :  { %328 = vmatpush.bf16.msra.mxu2 %v1516_v34  ;;  %341 = vmatpush.bf16.msra.mxu3 %v1520_v38  ;;  %v2046_v54 = vld [vmem:[#allocation5 + $0x6c] sm:$0xf]  ;;  %v1485_v55 = vld [vmem:[#allocation5 + $0x78] sm:$0xf0]  ;;  %v1480_v57 = vor.u32 %v2045_v49, %v1477_v51  ;;  %v1484_v58 = vor.u32 %v2048_v53, %v1483_v52  ;;  %v1459_v59 = vld [vmem:[#allocation5 + $0x40] sm:$0xf] }
  0x26   :  { %v2043_v60 = vld [vmem:[#allocation5 + $0x4c] sm:$0xf0]  ;;  %v2041_v61 = vld [vmem:[#allocation5 + $0x44] sm:$0xf]  ;;  %v1488_v62 = vor.u32 %v2046_v54, %v1485_v55  ;;  %v1461_v63 = vld [vmem:[#allocation5 + $0x50] sm:$0xf0] }
  0x27   :  { %303 = vmatpush.bf16.msra.mxu0 %v1492_v44  ;;  %v1467_v0 = vld [vmem:[#allocation5 + $0x48] sm:$0xf]  ;;  %v2044_v1 = vld [vmem:[#allocation5 + $0x54] sm:$0xf0]  ;;  %v2042_v2 = vld [vmem:[#allocation5 + $0x4c] sm:$0xf]  ;;  %v1460_v4 = vor.u32 %v2043_v60, %v1459_v59  ;;  %v1464_v5 = vor.u32 %v2041_v61, %v1461_v63 }
  0x28   :  { %316 = vmatpush.bf16.msra.mxu1 %v1496_v45  ;;  %v1469_v3 = vld [vmem:[#allocation5 + $0x58] sm:$0xf0]  ;;  %v1468_v6 = vor.u32 %v2044_v1, %v1467_v0  ;;  %v1443_v7 = vld [vmem:[#allocation5 + $0x20] sm:$0xf]  ;;  %v2039_v8 = vld [vmem:[#allocation5 + $0x2c] sm:$0xf0] }
  0x29   :  { %329 = vmatpush.bf16.msra.mxu2 %v1500_v46  ;;  %342 = vmatpush.bf16.msra.mxu3 %v1504_v50  ;;  %v2037_v9 = vld [vmem:[#allocation5 + $0x24] sm:$0xf]  ;;  %v1472_v10 = vor.u32 %v2042_v2, %v1469_v3  ;;  %v1445_v11 = vld [vmem:[#allocation5 + $0x30] sm:$0xf0]  ;;  %v1451_v12 = vld [vmem:[#allocation5 + $0x28] sm:$0xf]  ;;  %v1444_v16 = vor.u32 %v2039_v8, %v1443_v7 }
  0x2a   :  { %v2040_v13 = vld [vmem:[#allocation5 + $0x34] sm:$0xf0]  ;;  %v2038_v14 = vld [vmem:[#allocation5 + $0x2c] sm:$0xf]  ;;  %v1453_v15 = vld [vmem:[#allocation5 + $0x38] sm:$0xf0]  ;;  %v1448_v18 = vor.u32 %v2037_v9, %v1445_v11 }
  0x2b   :  { %304 = vmatpush.bf16.msra.mxu0 %v1476_v56  ;;  %v1427_v17 = vld [vmem:[#allocation5] sm:$0xf]  ;;  %v1452_v19 = vor.u32 %v2040_v13, %v1451_v12  ;;  %v2035_v20 = vld [vmem:[#allocation5 + $0xc] sm:$0xf0]  ;;  %v2033_v21 = vld [vmem:[#allocation5 + $0x4] sm:$0xf]  ;;  %v1456_v23 = vor.u32 %v2038_v14, %v1453_v15 }
  0x2c   :  { %317 = vmatpush.bf16.msra.mxu1 %v1480_v57  ;;  %v1429_v22 = vld [vmem:[#allocation5 + $0x10] sm:$0xf0]  ;;  %v1435_v24 = vld [vmem:[#allocation5 + $0x8] sm:$0xf]  ;;  %v2036_v25 = vld [vmem:[#allocation5 + $0x14] sm:$0xf0]  ;;  %v1428_v30 = vor.u32 %v2035_v20, %v1427_v17 }
  0x2d   :  { %330 = vmatpush.bf16.msra.mxu2 %v1484_v58  ;;  %343 = vmatpush.bf16.msra.mxu3 %v1488_v62  ;;  %v2034_v26 = vld [vmem:[#allocation5 + $0xc] sm:$0xf]  ;;  %v1437_v27 = vld [vmem:[#allocation5 + $0x18] sm:$0xf0]  ;;  %v1639_v28 = vld [vmem:[#allocation7 + $0xa8] sm:$0xf]  ;;  %v1432_v33 = vor.u32 %v2033_v21, %v1429_v22  ;;  %v1436_v34 = vor.u32 %v2036_v25, %v1435_v24 }
  0x2e   :  { %v2087_v29 = vld [vmem:[#allocation7 + $0xb0] sm:$0xf0]  ;;  %v1735_v31 = vld [vmem:[#allocation7 + $0x168] sm:$0xf]  ;;  %v1440_v35 = vor.u32 %v2034_v26, %v1437_v27  ;;  %v1627_v37 = vld [vmem:[#allocation7 + $0x90] sm:$0xf] }
  0x2f   :  { %305 = vmatpush.bf16.msra.mxu0 %v1460_v4  ;;  %v2111_v32 = vld [vmem:[#allocation7 + $0x170] sm:$0xf0]  ;;  %v1640_v36 = vor.u32 %v2087_v29, %v1639_v28  ;;  %v1831_v38 = vld [vmem:[#allocation7 + $0x228] sm:$0xf]  ;;  %v2084_v41 = vld [vmem:[#allocation7 + $0x98] sm:$0xf0] }
  0x30   :  { %318 = vmatpush.bf16.msra.mxu1 %v1464_v5  ;;  %v2135_v39 = vld [vmem:[#allocation7 + $0x230] sm:$0xf0]  ;;  %v1736_v40 = vor.u32 %v2111_v32, %v1735_v31  ;;  %v1927_v42 = vld [vmem:[#allocation7 + $0x2e8] sm:$0xf]  ;;  %v98_v44 = vld [vmem:[#allocation2] sm:$0xf]  ;;  %v1628_v48 = vor.u32 %v2084_v41, %v1627_v37 }
  0x31   :  { %331 = vmatpush.bf16.msra.mxu2 %v1468_v6  ;;  %344 = vmatpush.bf16.msra.mxu3 %v1472_v10  ;;  %v2159_v43 = vld [vmem:[#allocation7 + $0x2f0] sm:$0xf0]  ;;  %v1723_v45 = vld [vmem:[#allocation7 + $0x150] sm:$0xf]  ;;  %v2108_v46 = vld [vmem:[#allocation7 + $0x158] sm:$0xf0]  ;;  %v1832_v47 = vor.u32 %v2135_v39, %v1831_v38 }
  0x32   :  { %v1928_v49 = vor.u32 %v2159_v43, %v1927_v42  ;;  %v1615_v50 = vld [vmem:[#allocation7 + $0x78] sm:$0xf]  ;;  %v1819_v51 = vld [vmem:[#allocation7 + $0x210] sm:$0xf]  ;;  %v2132_v52 = vld [vmem:[#allocation7 + $0x218] sm:$0xf0]  ;;  %v1724_v53 = vor.u32 %v2108_v46, %v1723_v45 }
  0x33   :  { %306 = vmatpush.bf16.msra.mxu0 %v1444_v16  ;;  %v2081_v54 = vld [vmem:[#allocation7 + $0x80] sm:$0xf0]  ;;  %v1915_v55 = vld [vmem:[#allocation7 + $0x2d0] sm:$0xf]  ;;  %v2156_v56 = vld [vmem:[#allocation7 + $0x2d8] sm:$0xf0]  ;;  %v1820_v59 = vor.u32 %v2132_v52, %v1819_v51 }
  0x34   :  { %319 = vmatpush.bf16.msra.mxu1 %v1448_v18  ;;  %v1711_v57 = vld [vmem:[#allocation7 + $0x138] sm:$0xf]  ;;  %v2105_v58 = vld [vmem:[#allocation7 + $0x140] sm:$0xf0]  ;;  %v1616_v60 = vor.u32 %v2081_v54, %v1615_v50  ;;  %v1916_v61 = vor.u32 %v2156_v56, %v1915_v55  ;;  %v1603_v62 = vld [vmem:[#allocation7 + $0x60] sm:$0xf] }
  0x35   :  { %332 = vmatpush.bf16.msra.mxu2 %v1452_v19  ;;  %345 = vmatpush.bf16.msra.mxu3 %v1456_v23  ;;  %v1807_v63 = vld [vmem:[#allocation7 + $0x1f8] sm:$0xf]  ;;  %v2129_v0 = vld [vmem:[#allocation7 + $0x200] sm:$0xf0]  ;;  %v1712_v1 = vor.u32 %v2105_v58, %v1711_v57  ;;  %v2078_v2 = vld [vmem:[#allocation7 + $0x68] sm:$0xf0] }
  0x36   :  { %v1903_v3 = vld [vmem:[#allocation7 + $0x2b8] sm:$0xf]  ;;  %v2153_v4 = vld [vmem:[#allocation7 + $0x2c0] sm:$0xf0]  ;;  %v1699_v5 = vld [vmem:[#allocation7 + $0x120] sm:$0xf]  ;;  %v1808_v7 = vor.u32 %v2129_v0, %v1807_v63  ;;  %v1604_v8 = vor.u32 %v2078_v2, %v1603_v62 }
  0x37   :  { %307 = vmatpush.bf16.msra.mxu0 %v1428_v30  ;;  %v2102_v6 = vld [vmem:[#allocation7 + $0x128] sm:$0xf0]  ;;  %v1904_v9 = vor.u32 %v2153_v4, %v1903_v3  ;;  %v1591_v10 = vld [vmem:[#allocation7 + $0x48] sm:$0xf]  ;;  %v1795_v11 = vld [vmem:[#allocation7 + $0x1e0] sm:$0xf] }
  0x38   :  { %320 = vmatpush.bf16.msra.mxu1 %v1432_v33  ;;  %v2126_v12 = vld [vmem:[#allocation7 + $0x1e8] sm:$0xf0]  ;;  %v1700_v13 = vor.u32 %v2102_v6, %v1699_v5  ;;  %v2075_v14 = vld [vmem:[#allocation7 + $0x50] sm:$0xf0]  ;;  %v1891_v15 = vld [vmem:[#allocation7 + $0x2a0] sm:$0xf] }
  0x39   :  { %333 = vmatpush.bf16.msra.mxu2 %v1436_v34  ;;  %346 = vmatpush.bf16.msra.mxu3 %v1440_v35  ;;  %v2150_v16 = vld [vmem:[#allocation7 + $0x2a8] sm:$0xf0]  ;;  %v1687_v17 = vld [vmem:[#allocation7 + $0x108] sm:$0xf]  ;;  %v2099_v18 = vld [vmem:[#allocation7 + $0x110] sm:$0xf0]  ;;  %v1796_v19 = vor.u32 %v2126_v12, %v1795_v11  ;;  %v1592_v20 = vor.u32 %v2075_v14, %v1591_v10 }
  0x3a   :  { %308 = vmatmul.bf16.vlgmr.msra.gmra.mxu0 %v98_v44  ;;  %v1892_v21 = vor.u32 %v2150_v16, %v1891_v15  ;;  %v1579_v22 = vld [vmem:[#allocation7 + $0x30] sm:$0xf]  ;;  %v1783_v23 = vld [vmem:[#allocation7 + $0x1c8] sm:$0xf]  ;;  %v2123_v24 = vld [vmem:[#allocation7 + $0x1d0] sm:$0xf0]  ;;  %v1688_v25 = vor.u32 %v2099_v18, %v1687_v17 }
  0x3b   :  { %1007 = vmatpush.bf16.msrb.mxu0 %v1640_v36  ;;  %321 = vmatmul.bf16.vlgmr.msra.gmra.mxu1 %v98_v44  ;;  %v2072_v26 = vld [vmem:[#allocation7 + $0x38] sm:$0xf0]  ;;  %v1879_v27 = vld [vmem:[#allocation7 + $0x288] sm:$0xf]  ;;  %v2147_v28 = vld [vmem:[#allocation7 + $0x290] sm:$0xf0]  ;;  %v1784_v31 = vor.u32 %v2123_v24, %v1783_v23 }
  0x3c   :  { %1020 = vmatpush.bf16.msrb.mxu1 %v1736_v40  ;;  %334 = vmatmul.bf16.vlgmr.msra.gmra.mxu2 %v98_v44  ;;  %v1675_v29 = vld [vmem:[#allocation7 + $0xf0] sm:$0xf]  ;;  %v2096_v30 = vld [vmem:[#allocation7 + $0xf8] sm:$0xf0]  ;;  %v1580_v32 = vor.u32 %v2072_v26, %v1579_v22  ;;  %v1880_v33 = vor.u32 %v2147_v28, %v1879_v27  ;;  %v1567_v34 = vld [vmem:[#allocation7 + $0x18] sm:$0xf] }
  0x3d   :  { %347 = vmatmul.bf16.vlgmr.msra.gmra.mxu3 %v98_v44  ;;  %1033 = vmatpush.bf16.msrb.mxu2 %v1832_v47  ;;  %v1771_v35 = vld [vmem:[#allocation7 + $0x1b0] sm:$0xf]  ;;  %v2120_v36 = vld [vmem:[#allocation7 + $0x1b8] sm:$0xf0]  ;;  %v1676_v37 = vor.u32 %v2096_v30, %v1675_v29  ;;  %v2069_v38 = vld [vmem:[#allocation7 + $0x20] sm:$0xf0] }
  0x3e   :  { %1046 = vmatpush.bf16.msrb.mxu3 %v1928_v49  ;;  %v1867_v39 = vld [vmem:[#allocation7 + $0x270] sm:$0xf]  ;;  %v2144_v40 = vld [vmem:[#allocation7 + $0x278] sm:$0xf0]  ;;  %v1663_v41 = vld [vmem:[#allocation7 + $0xd8] sm:$0xf]  ;;  %v1772_v43 = vor.u32 %v2120_v36, %v1771_v35  ;;  %v1568_v45 = vor.u32 %v2069_v38, %v1567_v34 }
  0x3f   :  { %1008 = vmatpush.bf16.msrb.mxu0 %v1628_v48  ;;  %v2093_v42 = vld [vmem:[#allocation7 + $0xe0] sm:$0xf0]  ;;  %v1555_v44 = vld [vmem:[#allocation7] sm:$0xf]  ;;  %v1868_v46 = vor.u32 %v2144_v40, %v1867_v39  ;;  %v2066_v47 = vld [vmem:[#allocation7 + $0x8] sm:$0xf0] }
  0x40   :  { %1021 = vmatpush.bf16.msrb.mxu1 %v1724_v53  ;;  %v1759_v48 = vld [vmem:[#allocation7 + $0x198] sm:$0xf]  ;;  %v2117_v49 = vld [vmem:[#allocation7 + $0x1a0] sm:$0xf0]  ;;  %v1664_v50 = vor.u32 %v2093_v42, %v1663_v41  ;;  %v1651_v51 = vld [vmem:[#allocation7 + $0xc0] sm:$0xf] }
  0x41   :  { %1034 = vmatpush.bf16.msrb.mxu2 %v1820_v59  ;;  %v1855_v52 = vld [vmem:[#allocation7 + $0x258] sm:$0xf]  ;;  %v2141_v53 = vld [vmem:[#allocation7 + $0x260] sm:$0xf0]  ;;  %v2090_v54 = vld [vmem:[#allocation7 + $0xc8] sm:$0xf0]  ;;  %v1760_v59 = vor.u32 %v2117_v49, %v1759_v48 }
  0x42   :  { %1047 = vmatpush.bf16.msrb.mxu3 %v1916_v61  ;;  %v2086_v55 = vld [vmem:[#allocation7 + $0xac] sm:$0xf]  ;;  %v1641_v56 = vld [vmem:[#allocation7 + $0xb4] sm:$0xf0]  ;;  %v1856_v61 = vor.u32 %v2141_v53, %v1855_v52  ;;  %v2083_v62 = vld [vmem:[#allocation7 + $0x94] sm:$0xf]  ;;  %v1652_v2 = vor.u32 %v2090_v54, %v1651_v51 }
  0x43   :  { %1009 = vmatpush.bf16.msrb.mxu0 %v1616_v60  ;;  %v2110_v57 = vld [vmem:[#allocation7 + $0x16c] sm:$0xf]  ;;  %v1737_v58 = vld [vmem:[#allocation7 + $0x174] sm:$0xf0]  ;;  %v1556_v60 = vor.u32 %v2066_v47, %v1555_v44  ;;  %v1747_v63 = vld [vmem:[#allocation7 + $0x180] sm:$0xf]  ;;  %v1644_v3 = vor.u32 %v2086_v55, %v1641_v56 }
  0x44   :  { %1022 = vmatpush.bf16.msrb.mxu1 %v1712_v1  ;;  %v2114_v0 = vld [vmem:[#allocation7 + $0x188] sm:$0xf0]  ;;  %v1843_v1 = vld [vmem:[#allocation7 + $0x240] sm:$0xf]  ;;  %v1833_v6 = vld [vmem:[#allocation7 + $0x234] sm:$0xf0] }
  0x45   :  { %1035 = vmatpush.bf16.msrb.mxu2 %v1808_v7  ;;  %v2138_v4 = vld [vmem:[#allocation7 + $0x248] sm:$0xf0]  ;;  %v1740_v7 = vor.u32 %v2110_v57, %v1737_v58  ;;  %v1929_v10 = vld [vmem:[#allocation7 + $0x2f4] sm:$0xf0]  ;;  %v2107_v11 = vld [vmem:[#allocation7 + $0x154] sm:$0xf] }
  0x46   :  { %1048 = vmatpush.bf16.msrb.mxu3 %v1904_v9  ;;  %v2134_v5 = vld [vmem:[#allocation7 + $0x22c] sm:$0xf]  ;;  %v1725_v12 = vld [vmem:[#allocation7 + $0x15c] sm:$0xf0]  ;;  %v1844_v14 = vor.u32 %v2138_v4, %v1843_v1  ;;  %v2080_v18 = vld [vmem:[#allocation7 + $0x7c] sm:$0xf] }
  0x47   :  { %1010 = vmatpush.bf16.msrb.mxu0 %v1604_v8  ;;  %v1629_v8 = vld [vmem:[#allocation7 + $0x9c] sm:$0xf0]  ;;  %v2158_v9 = vld [vmem:[#allocation7 + $0x2ec] sm:$0xf]  ;;  %v1836_v15 = vor.u32 %v2134_v5, %v1833_v6  ;;  %v1617_v22 = vld [vmem:[#allocation7 + $0x84] sm:$0xf0] }
  0x48   :  { %1023 = vmatpush.bf16.msrb.mxu1 %v1700_v13  ;;  %v1748_v13 = vor.u32 %v2114_v0, %v1747_v63  ;;  %v1632_v16 = vor.u32 %v2083_v62, %v1629_v8  ;;  %v1932_v17 = vor.u32 %v2158_v9, %v1929_v10  ;;  %v2155_v23 = vld [vmem:[#allocation7 + $0x2d4] sm:$0xf]  ;;  %v1917_v24 = vld [vmem:[#allocation7 + $0x2dc] sm:$0xf0]  ;;  %v1713_v26 = vld [vmem:[#allocation7 + $0x144] sm:$0xf0]  ;;  %v1620_v28 = vor.u32 %v2080_v18, %v1617_v22 }
  0x49   :  { %1036 = vmatpush.bf16.msrb.mxu2 %v1796_v19  ;;  %v2131_v19 = vld [vmem:[#allocation7 + $0x214] sm:$0xf]  ;;  %v1920_v29 = vor.u32 %v2155_v23, %v1917_v24  ;;  %v2077_v30 = vld [vmem:[#allocation7 + $0x64] sm:$0xf]  ;;  %v1605_v34 = vld [vmem:[#allocation7 + $0x6c] sm:$0xf0] }
  0x4a   :  { %1049 = vmatpush.bf16.msrb.mxu3 %v1892_v21  ;;  %v1728_v21 = vor.u32 %v2107_v11, %v1725_v12  ;;  %v2152_v35 = vld [vmem:[#allocation7 + $0x2bc] sm:$0xf]  ;;  %v1905_v36 = vld [vmem:[#allocation7 + $0x2c4] sm:$0xf0]  ;;  %v1701_v38 = vld [vmem:[#allocation7 + $0x12c] sm:$0xf0]  ;;  %v1608_v40 = vor.u32 %v2077_v30, %v1605_v34 }
  0x4b   :  { %1011 = vmatpush.bf16.msrb.mxu0 %v1592_v20  ;;  %v1821_v20 = vld [vmem:[#allocation7 + $0x21c] sm:$0xf0]  ;;  %v1908_v41 = vor.u32 %v2152_v35, %v1905_v36  ;;  %v2074_v42 = vld [vmem:[#allocation7 + $0x4c] sm:$0xf]  ;;  %v1797_v44 = vld [vmem:[#allocation7 + $0x1ec] sm:$0xf0] }
  0x4c   :  { %1024 = vmatpush.bf16.msrb.mxu1 %v1688_v25  ;;  %v2104_v25 = vld [vmem:[#allocation7 + $0x13c] sm:$0xf]  ;;  %v1824_v27 = vor.u32 %v2131_v19, %v1821_v20  ;;  %v2149_v47 = vld [vmem:[#allocation7 + $0x2a4] sm:$0xf]  ;;  %v1893_v48 = vld [vmem:[#allocation7 + $0x2ac] sm:$0xf0] }
  0x4d   :  { %1037 = vmatpush.bf16.msrb.mxu2 %v1784_v31  ;;  %v2128_v31 = vld [vmem:[#allocation7 + $0x1fc] sm:$0xf]  ;;  %v2098_v49 = vld [vmem:[#allocation7 + $0x10c] sm:$0xf]  ;;  %v1896_v53 = vor.u32 %v2149_v47, %v1893_v48  ;;  %v2071_v55 = vld [vmem:[#allocation7 + $0x34] sm:$0xf] }
  0x4e   :  { %1050 = vmatpush.bf16.msrb.mxu3 %v1880_v33  ;;  %v1716_v33 = vor.u32 %v2104_v25, %v1713_v26  ;;  %v1581_v56 = vld [vmem:[#allocation7 + $0x3c] sm:$0xf0]  ;;  %v2095_v57 = vld [vmem:[#allocation7 + $0xf4] sm:$0xf]  ;;  %v1785_v62 = vld [vmem:[#allocation7 + $0x1d4] sm:$0xf0] }
  0x4f   :  { %1012 = vmatpush.bf16.msrb.mxu0 %v1580_v32  ;;  %v1809_v32 = vld [vmem:[#allocation7 + $0x204] sm:$0xf0]  ;;  %v1677_v58 = vld [vmem:[#allocation7 + $0xfc] sm:$0xf0]  ;;  %v2146_v63 = vld [vmem:[#allocation7 + $0x28c] sm:$0xf] }
  0x50   :  { %1025 = vmatpush.bf16.msrb.mxu1 %v1676_v37  ;;  %v2101_v37 = vld [vmem:[#allocation7 + $0x124] sm:$0xf]  ;;  %v1812_v39 = vor.u32 %v2128_v31, %v1809_v32  ;;  %v1881_v1 = vld [vmem:[#allocation7 + $0x294] sm:$0xf0]  ;;  %v1569_v4 = vld [vmem:[#allocation7 + $0x24] sm:$0xf0] }
  0x51   :  { %1038 = vmatpush.bf16.msrb.mxu2 %v1772_v43  ;;  %v2125_v43 = vld [vmem:[#allocation7 + $0x1e4] sm:$0xf]  ;;  %v2092_v5 = vld [vmem:[#allocation7 + $0xdc] sm:$0xf]  ;;  %v2119_v9 = vld [vmem:[#allocation7 + $0x1b4] sm:$0xf] }
  0x52   :  { %1051 = vmatpush.bf16.msrb.mxu3 %v1868_v46  ;;  %v1593_v46 = vld [vmem:[#allocation7 + $0x54] sm:$0xf0]  ;;  %v1800_v51 = vor.u32 %v2125_v43, %v1797_v44  ;;  %v1773_v10 = vld [vmem:[#allocation7 + $0x1bc] sm:$0xf0]  ;;  %v2143_v11 = vld [vmem:[#allocation7 + $0x274] sm:$0xf] }
  0x53   :  { %1013 = vmatpush.bf16.msrb.mxu0 %v1568_v45  ;;  %v1704_v45 = vor.u32 %v2101_v37, %v1701_v38  ;;  %v1596_v52 = vor.u32 %v2074_v42, %v1593_v46  ;;  %v1776_v12 = vor.u32 %v2119_v9, %v1773_v10  ;;  %v2089_v18 = vld [vmem:[#allocation7 + $0xc4] sm:$0xf]  ;;  %v1653_v19 = vld [vmem:[#allocation7 + $0xcc] sm:$0xf0]  ;;  %v1761_v22 = vld [vmem:[#allocation7 + $0x1a4] sm:$0xf0] }
  0x54   :  { %1026 = vmatpush.bf16.msrb.mxu1 %v1664_v50  ;;  %v1689_v50 = vld [vmem:[#allocation7 + $0x114] sm:$0xf0]  ;;  %v1656_v20 = vor.u32 %v2089_v18, %v1653_v19  ;;  %v2140_v24 = vld [vmem:[#allocation7 + $0x25c] sm:$0xf]  ;;  %v1857_v25 = vld [vmem:[#allocation7 + $0x264] sm:$0xf0] }
  0x55   :  { %1039 = vmatpush.bf16.msrb.mxu2 %v1760_v59  ;;  %v1692_v54 = vor.u32 %v2098_v49, %v1689_v50  ;;  %v1584_v59 = vor.u32 %v2071_v55, %v1581_v56  ;;  %v1860_v26 = vor.u32 %v2140_v24, %v1857_v25  ;;  %v2137_v30 = vld [vmem:[#allocation7 + $0x244] sm:$0xf]  ;;  %v1845_v31 = vld [vmem:[#allocation7 + $0x24c] sm:$0xf0]  ;;  %v2112_v43 = vld [vmem:[#allocation7 + $0x178] sm:$0xf0] }
  0x56   :  { %1052 = vmatpush.bf16.msrb.mxu3 %v1856_v61  ;;  %v2122_v61 = vld [vmem:[#allocation7 + $0x1cc] sm:$0xf]  ;;  %v1848_v32 = vor.u32 %v2137_v30, %v1845_v31  ;;  %v1743_v42 = vld [vmem:[#allocation7 + $0x170] sm:$0xf]  ;;  %v2109_v55 = vld [vmem:[#allocation7 + $0x160] sm:$0xf0] }
  0x57   :  { %1014 = vmatpush.bf16.msrb.mxu0 %v1556_v60  ;;  %v1680_v60 = vor.u32 %v2095_v57, %v1677_v58  ;;  %v1788_v0 = vor.u32 %v2122_v61, %v1785_v62  ;;  %v1744_v50 = vor.u32 %v2112_v43, %v1743_v42  ;;  %v1839_v61 = vld [vmem:[#allocation7 + $0x230] sm:$0xf]  ;;  %v2136_v62 = vld [vmem:[#allocation7 + $0x238] sm:$0xf0]  ;;  %v2157_v19 = vld [vmem:[#allocation7 + $0x2e0] sm:$0xf0] }
  0x58   :  { %1027 = vmatpush.bf16.msrb.mxu1 %v1652_v2  ;;  %v1884_v2 = vor.u32 %v2146_v63, %v1881_v1  ;;  %v1935_v63 = vld [vmem:[#allocation7 + $0x2f0] sm:$0xf]  ;;  %v1840_v10 = vor.u32 %v2136_v62, %v1839_v61  ;;  %v2130_v30 = vld [vmem:[#allocation7 + $0x208] sm:$0xf0]  ;;  %v1671_v62 = vld [vmem:[#allocation7 + $0xe0] sm:$0xf] }
  0x59   :  { %1040 = vmatpush.bf16.msrb.mxu2 %v1748_v13  ;;  %v1869_v13 = vld [vmem:[#allocation7 + $0x27c] sm:$0xf0]  ;;  %v2070_v61 = vld [vmem:[#allocation7 + $0x28] sm:$0xf0]  ;;  %s2363_s2 = smov [#allocation11]   ;;  %s1413_s23 = sshll.u32 %s2437_s5, 4  ;;  %s1414_s23 = int_to_ptr.hbm [resolvable:$true] %s1413_s23 }
  0x5a   :  { %1053 = vmatpush.bf16.msrb.mxu3 %v1844_v14  ;;  %v1872_v14 = vor.u32 %v2143_v11, %v1869_v13  ;;  %s1411_s4 = sshll.u32 %s2363_s2, 4  ;;  %s1412_s4 = int_to_ptr.vmem [resolvable:$true] %s1411_s4 }
  0x5b   :  { %1059 = vmatpush.bf16.msra.mxu0 %v1644_v3  ;;  %v2068_v3 = vld [vmem:[#allocation7 + $0x1c] sm:$0xf] }
  0x5c   :  { %1072 = vmatpush.bf16.msra.mxu1 %v1740_v7  ;;  %v1572_v6 = vor.u32 %v2068_v3, %v1569_v4  ;;  %v1665_v7 = vld [vmem:[#allocation7 + $0xe4] sm:$0xf0]  ;;  %v2160_v3 = vld [vmem:[#allocation7 + $0x2f8] sm:$0xf0]  ;;  %v1623_v4 = vld [vmem:[#allocation7 + $0x80] sm:$0xf] }
  0x5d   :  { %1085 = vmatpush.bf16.msra.mxu2 %v1836_v15  ;;  %v1668_v8 = vor.u32 %v2092_v5, %v1665_v7  ;;  %v2065_v15 = vld [vmem:[#allocation7 + $0x4] sm:$0xf]  ;;  %v2082_v5 = vld [vmem:[#allocation7 + $0x88] sm:$0xf0]  ;;  %v1719_v7 = vld [vmem:[#allocation7 + $0x140] sm:$0xf] }
  0x5e   :  { %1098 = vmatpush.bf16.msra.mxu3 %v1932_v17  ;;  %v1624_v13 = vor.u32 %v2082_v5, %v1623_v4 }
  0x5f   :  { %1060 = vmatpush.bf16.msra.mxu0 %v1632_v16  ;;  %v1557_v16 = vld [vmem:[#allocation7 + $0xc] sm:$0xf0] }
  0x60   :  { %1073 = vmatpush.bf16.msra.mxu1 %v1728_v21  ;;  %v1560_v17 = vor.u32 %v2065_v15, %v1557_v16  ;;  %v2116_v21 = vld [vmem:[#allocation7 + $0x19c] sm:$0xf]  ;;  %v2133_v15 = vld [vmem:[#allocation7 + $0x220] sm:$0xf0]  ;;  %v1923_v16 = vld [vmem:[#allocation7 + $0x2d8] sm:$0xf] }
  0x61   :  { %1086 = vmatpush.bf16.msra.mxu2 %v1824_v27  ;;  %v1764_v23 = vor.u32 %v2116_v21, %v1761_v22  ;;  %v2113_v27 = vld [vmem:[#allocation7 + $0x184] sm:$0xf]  ;;  %v2079_v21 = vld [vmem:[#allocation7 + $0x70] sm:$0xf0]  ;;  %v1707_v22 = vld [vmem:[#allocation7 + $0x128] sm:$0xf] }
  0x62   :  { %1099 = vmatpush.bf16.msra.mxu3 %v1920_v29 }
  0x63   :  { %1061 = vmatpush.bf16.msra.mxu0 %v1620_v28  ;;  %v1749_v28 = vld [vmem:[#allocation7 + $0x18c] sm:$0xf0] }
  0x64   :  { %1074 = vmatpush.bf16.msra.mxu1 %v1716_v33  ;;  %v1752_v29 = vor.u32 %v2113_v27, %v1749_v28  ;;  %v95_v33 = vld [vmem:[#allocation10] sm:$0xf]  ;;  %v1924_v27 = vor.u32 %v2157_v19, %v1923_v16  ;;  %v2118_v16 = vld [vmem:[#allocation7 + $0x1a8] sm:$0xf0] }
  0x65   :  { %1087 = vmatpush.bf16.msra.mxu2 %v1812_v39  ;;  %v132_v34 = vperm.slane %v95_v33, 0  ;;  %v133_v35 = vperm.slane %v95_v33, 1  ;;  %v1647_v39 = vld [vmem:[#allocation7 + $0xb0] sm:$0xf]  ;;  %v134_v46 = vperm.slane %v95_v33, 2  ;;  %v135_v49 = vperm.slane %v95_v33, 3 }
  0x66   :  { %1100 = vmatpush.bf16.msra.mxu3 %v1908_v41  ;;  %v2154_v33 = vld [vmem:[#allocation7 + $0x2c8] sm:$0xf0] }
  0x67   :  { %1062 = vmatpush.bf16.msra.mxu0 %v1608_v40  ;;  %v2088_v40 = vld [vmem:[#allocation7 + $0xb8] sm:$0xf0] }
  0x68   :  { %1075 = vmatpush.bf16.msra.mxu1 %v1704_v45  ;;  %v1648_v47 = vor.u32 %v2088_v40, %v1647_v39  ;;  %v1803_v40 = vld [vmem:[#allocation7 + $0x1e8] sm:$0xf] }
  0x69   :  { %1088 = vmatpush.bf16.msra.mxu2 %v1800_v51  ;;  %v1635_v51 = vld [vmem:[#allocation7 + $0x98] sm:$0xf] }
  0x6a   :  { %1101 = vmatpush.bf16.msra.mxu3 %v1896_v53 }
  0x6b   :  { %1063 = vmatpush.bf16.msra.mxu0 %v1596_v52  ;;  %v2085_v52 = vld [vmem:[#allocation7 + $0xa0] sm:$0xf0] }
  0x6c   :  { %1076 = vmatpush.bf16.msra.mxu1 %v1692_v54  ;;  %v1731_v54 = vld [vmem:[#allocation7 + $0x158] sm:$0xf] }
  0x6d   :  { %1089 = vmatpush.bf16.msra.mxu2 %v1788_v0 }
  0x6e   :  { %1102 = vmatpush.bf16.msra.mxu3 %v1884_v2  ;;  %v1732_v2 = vor.u32 %v2109_v55, %v1731_v54  ;;  %v1791_v54 = vld [vmem:[#allocation7 + $0x1d0] sm:$0xf]  ;;  %v2124_v55 = vld [vmem:[#allocation7 + $0x1d8] sm:$0xf0] }
  0x6f   :  { %1064 = vmatpush.bf16.msra.mxu0 %v1584_v59 }
  0x70   :  { %1077 = vmatpush.bf16.msra.mxu1 %v1680_v60  ;;  %v1636_v60 = vor.u32 %v2085_v52, %v1635_v51 }
  0x71   :  { %1090 = vmatpush.bf16.msra.mxu2 %v1776_v12  ;;  %v1936_v12 = vor.u32 %v2160_v3, %v1935_v63  ;;  %v2094_v63 = vld [vmem:[#allocation7 + $0xe8] sm:$0xf0]  ;;  %v2121_v3 = vld [vmem:[#allocation7 + $0x1c0] sm:$0xf0] }
  0x72   :  { %1103 = vmatpush.bf16.msra.mxu3 %v1872_v14  ;;  %v1827_v14 = vld [vmem:[#allocation7 + $0x218] sm:$0xf]  ;;  %v1672_v5 = vor.u32 %v2094_v63, %v1671_v62 }
  0x73   :  { %1065 = vmatpush.bf16.msra.mxu0 %v1572_v6  ;;  %v1828_v25 = vor.u32 %v2133_v15, %v1827_v14  ;;  %v1767_v15 = vld [vmem:[#allocation7 + $0x1a0] sm:$0xf] }
  0x74   :  { %1078 = vmatpush.bf16.msra.mxu1 %v1668_v8  ;;  %v2106_v8 = vld [vmem:[#allocation7 + $0x148] sm:$0xf0] }
  0x75   :  { %1091 = vmatpush.bf16.msra.mxu2 %v1764_v23  ;;  %v1720_v18 = vor.u32 %v2106_v8, %v1719_v7  ;;  %v2103_v23 = vld [vmem:[#allocation7 + $0x130] sm:$0xf0]  ;;  %v2145_v7 = vld [vmem:[#allocation7 + $0x280] sm:$0xf0]  ;;  %v1563_v8 = vld [vmem:[#allocation7 + $0x8] sm:$0xf] }
  0x76   :  { %1104 = vmatpush.bf16.msra.mxu3 %v1860_v26  ;;  %v1708_v31 = vor.u32 %v2103_v23, %v1707_v22  ;;  %v2168_v22 = vld [vmem:[#allocation8 + $0x38] sm:$0xff]  ;;  %v1768_v23 = vor.u32 %v2118_v16, %v1767_v15 }
  0x77   :  { %1066 = vmatpush.bf16.msra.mxu0 %v1560_v17 }
  0x78   :  { %1079 = vmatpush.bf16.msra.mxu1 %v1656_v20  ;;  %v1611_v20 = vld [vmem:[#allocation7 + $0x68] sm:$0xf] }
  0x79   :  { %1092 = vmatpush.bf16.msra.mxu2 %v1752_v29  ;;  %v1612_v28 = vor.u32 %v2079_v21, %v1611_v20  ;;  %v1815_v29 = vld [vmem:[#allocation7 + $0x200] sm:$0xf]  ;;  %v2142_v21 = vld [vmem:[#allocation7 + $0x268] sm:$0xf0] }
  0x7a   :  { %1105 = vmatpush.bf16.msra.mxu3 %v1848_v32  ;;  %v1911_v32 = vld [vmem:[#allocation7 + $0x2c0] sm:$0xf] }
  0x7b   :  { %v1912_v39 = vor.u32 %v2154_v33, %v1911_v32  ;;  %v1863_v20 = vld [vmem:[#allocation7 + $0x260] sm:$0xf]  ;;  %v2166_v32 = vld [vmem:[#allocation8 + $0x28] sm:$0xff] }
  0x7c   :  { %v2165_v33 = vld [vmem:[#allocation8 + $0x20] sm:$0xff] }
  0xb7   :  { %v309_v36 = vpop.f32.mrf.mxu0 }
  0xb8   :  { %v310_v37 = vadd.f32 %v309_v36, %v132_v34  ;;  %v322_v38 = vpop.f32.mrf.mxu1  ;;  %v1599_v34 = vld [vmem:[#allocation7 + $0x50] sm:$0xf] }
  0xb9   :  { %v323_v41 = vadd.f32 %v322_v38, %v133_v35  ;;  %v2076_v35 = vld [vmem:[#allocation7 + $0x58] sm:$0xf0]  ;;  %v1695_v36 = vld [vmem:[#allocation7 + $0x110] sm:$0xf]  ;;  %v1816_v38 = vor.u32 %v2130_v30, %v1815_v29 }
  0xba   :  { %v352_v44 = vmax.f32 %v310_v37, 0.0  ;;  %v2100_v37 = vld [vmem:[#allocation7 + $0x118] sm:$0xf0]  ;;  %v1600_v42 = vor.u32 %v2076_v35, %v1599_v34  ;;  %v2167_v29 = vld [vmem:[#allocation8 + $0x30] sm:$0xff] }
  0xbb   :  { %v353_v45 = vmax.f32 %v323_v41, 0.0  ;;  %v2127_v41 = vld [vmem:[#allocation7 + $0x1f0] sm:$0xf0]  ;;  %v1696_v43 = vor.u32 %v2100_v37, %v1695_v36  ;;  %v2176_v34 = vld [vmem:[#allocation8 + $0x78] sm:$0xff]  ;;  %v2174_v37 = vld [vmem:[#allocation8 + $0x68] sm:$0xff] }
  0xbc   :  { %v2409_v48 = vpack.c.bf16 %v352_v44, %v352_v44  ;;  %v1899_v44 = vld [vmem:[#allocation7 + $0x2a8] sm:$0xf]  ;;  %v1804_v51 = vor.u32 %v2127_v41, %v1803_v40  ;;  %v2164_v35 = vld [vmem:[#allocation8 + $0x18] sm:$0xff]  ;;  %v2163_v36 = vld [vmem:[#allocation8 + $0x10] sm:$0xff] }
  0xbd   :  { %v2411_v53 = vpack.c.bf16 %v353_v45, %v353_v45  ;;  %v2151_v45 = vld [vmem:[#allocation7 + $0x2b0] sm:$0xf0] }
  0xbe   :  { %1015 = vmatmul.bf16.vlgmr.msrb.gmra.mxu0 %v2409_v48  ;;  %v1900_v52 = vor.u32 %v2151_v45, %v1899_v44  ;;  %v2171_v40 = vld [vmem:[#allocation8 + $0x50] sm:$0xff]  ;;  %v96_v44 = vld [vmem:[#allocation10 + $0x4] sm:$0x7] }
  0xbf   :  { %v335_v56 = vpop.f32.mrf.mxu2  ;;  %1028 = vmatmul.bf16.vlgmr.msrb.gmra.mxu1 %v2411_v53  ;;  %v311_v59 = vpop.f32.mrf.mxu0  ;;  %1111 = vmatpush.bf16.msrb.mxu0 %v1648_v47  ;;  %v2073_v47 = vld [vmem:[#allocation7 + $0x40] sm:$0xf0]  ;;  %v2183_v41 = vld [vmem:[#allocation8 + $0xb0] sm:$0xff] }
  0xc0   :  { %v336_v57 = vadd.f32 %v335_v56, %v134_v46  ;;  %v348_v58 = vpop.f32.mrf.mxu3  ;;  %1124 = vmatpush.bf16.msrb.mxu1 %v1744_v50  ;;  %v324_v1 = vpop.f32.mrf.mxu1  ;;  %v1587_v46 = vld [vmem:[#allocation7 + $0x38] sm:$0xf]  ;;  %v2097_v50 = vld [vmem:[#allocation7 + $0x100] sm:$0xf0]  ;;  %v2148_v59 = vld [vmem:[#allocation7 + $0x298] sm:$0xf0] }
  0xc1   :  { %v349_v0 = vadd.f32 %v348_v58, %v135_v49  ;;  %v1683_v49 = vld [vmem:[#allocation7 + $0xf8] sm:$0xf]  ;;  %v1588_v56 = vor.u32 %v2073_v47, %v1587_v46  ;;  %v1887_v58 = vld [vmem:[#allocation7 + $0x290] sm:$0xf]  ;;  %v489_v47 = vperm.slane %v96_v44, 0 }
  0xc2   :  { %v354_v6 = vmax.f32 %v336_v57, 0.0  ;;  %v1684_v57 = vor.u32 %v2097_v50, %v1683_v49  ;;  %v1888_v1 = vor.u32 %v2148_v59, %v1887_v58  ;;  %v2169_v49 = vld [vmem:[#allocation8 + $0x40] sm:$0xff] }
  0xc3   :  { %v355_v9 = vmax.f32 %v349_v0, 0.0  ;;  %1112 = vmatpush.bf16.msrb.mxu0 %v1636_v60  ;;  %v1575_v60 = vld [vmem:[#allocation7 + $0x20] sm:$0xf]  ;;  %v1792_v0 = vor.u32 %v2124_v55, %v1791_v54 }
  0xc4   :  { %v2415_v11 = vpack.c.bf16 %v354_v6, %v354_v6  ;;  %1125 = vmatpush.bf16.msrb.mxu1 %v1732_v2  ;;  %v1779_v2 = vld [vmem:[#allocation7 + $0x1b8] sm:$0xf]  ;;  %v1576_v4 = vor.u32 %v2070_v61, %v1575_v60  ;;  %v2181_v50 = vld [vmem:[#allocation8 + $0xa0] sm:$0xff]  ;;  %v2178_v61 = vld [vmem:[#allocation8 + $0x88] sm:$0xff] }
  0xc5   :  { %v2417_v17 = vpack.c.bf16 %v355_v9, %v355_v9  ;;  %v1875_v6 = vld [vmem:[#allocation7 + $0x278] sm:$0xf]  ;;  %v2067_v9 = vld [vmem:[#allocation7 + $0x10] sm:$0xf0] }
  0xc6   :  { %1041 = vmatmul.bf16.vlgmr.msrb.gmra.mxu2 %v2415_v11  ;;  %v1876_v14 = vor.u32 %v2145_v7, %v1875_v6 }
  0xc7   :  { %1054 = vmatmul.bf16.vlgmr.msrb.gmra.mxu3 %v2417_v17  ;;  %v337_v24 = vpop.f32.mrf.mxu2  ;;  %1137 = vmatpush.bf16.msrb.mxu2 %v1840_v10  ;;  %v1659_v10 = vld [vmem:[#allocation7 + $0xc8] sm:$0xf] }
  0xc8   :  { %v350_v26 = vpop.f32.mrf.mxu3  ;;  %1150 = vmatpush.bf16.msrb.mxu3 %v1936_v12  ;;  %1113 = vmatpush.bf16.msrb.mxu0 %v1624_v13  ;;  %v2091_v12 = vld [vmem:[#allocation7 + $0xd0] sm:$0xf0]  ;;  %v1780_v13 = vor.u32 %v2121_v3, %v1779_v2  ;;  %v1864_v24 = vor.u32 %v2142_v21, %v1863_v20  ;;  %v2177_v2 = vld [vmem:[#allocation8 + $0x80] sm:$0xff]  ;;  %v491_v21 = vperm.slane %v96_v44, 2 }
  0xc9   :  { %1126 = vmatpush.bf16.msrb.mxu1 %v1720_v18  ;;  %v1564_v18 = vor.u32 %v2067_v9, %v1563_v8  ;;  %v1660_v19 = vor.u32 %v2091_v12, %v1659_v10  ;;  %v2115_v26 = vld [vmem:[#allocation7 + $0x190] sm:$0xf0] }
  0xcb   :  { %1138 = vmatpush.bf16.msrb.mxu2 %v1828_v25  ;;  %v1755_v25 = vld [vmem:[#allocation7 + $0x188] sm:$0xf] }
  0xcc   :  { %1151 = vmatpush.bf16.msrb.mxu3 %v1924_v27  ;;  %1114 = vmatpush.bf16.msrb.mxu0 %v1612_v28  ;;  %v1851_v27 = vld [vmem:[#allocation7 + $0x248] sm:$0xf]  ;;  %v2139_v28 = vld [vmem:[#allocation7 + $0x250] sm:$0xf0]  ;;  %v1756_v30 = vor.u32 %v2115_v26, %v1755_v25 }
  0xcd   :  { %1127 = vmatpush.bf16.msrb.mxu1 %v1708_v31  ;;  %v1852_v31 = vor.u32 %v2139_v28, %v1851_v27 }
  0xce   :  { %1067 = vmatmul.bf16.vlgmr.msra.gmra.mxu0 %v2409_v48 }
  0xcf   :  { %1139 = vmatpush.bf16.msrb.mxu2 %v1816_v38  ;;  %1080 = vmatmul.bf16.vlgmr.msra.gmra.mxu1 %v2411_v53  ;;  %v2161_v38 = vld [vmem:[#allocation8] sm:$0xff] }
  0xd0   :  { %1152 = vmatpush.bf16.msrb.mxu3 %v1912_v39  ;;  %1115 = vmatpush.bf16.msrb.mxu0 %v1600_v42  ;;  %v2173_v39 = vld [vmem:[#allocation8 + $0x60] sm:$0xff]  ;;  %v2170_v42 = vld [vmem:[#allocation8 + $0x48] sm:$0xff] }
  0xd1   :  { %1128 = vmatpush.bf16.msrb.mxu1 %v1696_v43  ;;  %v2182_v43 = vld [vmem:[#allocation8 + $0xa8] sm:$0xff] }
  0xd3   :  { %1140 = vmatpush.bf16.msrb.mxu2 %v1804_v51 }
  0xd4   :  { %1153 = vmatpush.bf16.msrb.mxu3 %v1900_v52  ;;  %1116 = vmatpush.bf16.msrb.mxu0 %v1588_v56  ;;  %v2180_v52 = vld [vmem:[#allocation8 + $0x98] sm:$0xff] }
  0xd5   :  { %1129 = vmatpush.bf16.msrb.mxu1 %v1684_v57  ;;  %v2179_v57 = vld [vmem:[#allocation8 + $0x90] sm:$0xff] }
  0xd6   :  { %1093 = vmatmul.bf16.vlgmr.msra.gmra.mxu2 %v2415_v11 }
  0xd7   :  { %1106 = vmatmul.bf16.vlgmr.msra.gmra.mxu3 %v2417_v17  ;;  %1141 = vmatpush.bf16.msrb.mxu2 %v1792_v0 }
  0xd8   :  { %1154 = vmatpush.bf16.msrb.mxu3 %v1888_v1  ;;  %1117 = vmatpush.bf16.msrb.mxu0 %v1576_v4  ;;  %v490_v4 = vperm.slane %v96_v44, 1 }
  0xd9   :  { %1130 = vmatpush.bf16.msrb.mxu1 %v1672_v5 }
  0xdb   :  { %1142 = vmatpush.bf16.msrb.mxu2 %v1780_v13 }
  0xdc   :  { %1155 = vmatpush.bf16.msrb.mxu3 %v1876_v14  ;;  %1118 = vmatpush.bf16.msrb.mxu0 %v1564_v18 }
  0xdd   :  { %1131 = vmatpush.bf16.msrb.mxu1 %v1660_v19 }
  0xdf   :  { %1143 = vmatpush.bf16.msrb.mxu2 %v1768_v23  ;;  %1119 = vmatmul.bf16.vlgmr.msrb.gmra.mxu0 %v2409_v48  ;;  %v2175_v48 = vld [vmem:[#allocation8 + $0x70] sm:$0xff] }
  0xe0   :  { %1364 = vmatpush.bf16.msra.mxu0 %v2168_v22  ;;  %1156 = vmatpush.bf16.msrb.mxu3 %v1864_v24 }
  0xe1   :  { %1132 = vmatmul.bf16.vlgmr.msrb.gmra.mxu1 %v2411_v53  ;;  %v2162_v53 = vld [vmem:[#allocation8 + $0x8] sm:$0xff] }
  0xe2   :  { %1377 = vmatpush.bf16.msra.mxu1 %v2176_v34 }
  0xe3   :  { %1144 = vmatpush.bf16.msrb.mxu2 %v1756_v30 }
  0xe4   :  { %1365 = vmatpush.bf16.msra.mxu0 %v2167_v29  ;;  %1157 = vmatpush.bf16.msrb.mxu3 %v1852_v31 }
  0xe6   :  { %1145 = vmatmul.bf16.vlgmr.msrb.gmra.mxu2 %v2415_v11  ;;  %1378 = vmatpush.bf16.msra.mxu1 %v2175_v48  ;;  %v2172_v11 = vld [vmem:[#allocation8 + $0x58] sm:$0xff] }
  0xe7   :  { %1158 = vmatmul.bf16.vlgmr.msrb.gmra.mxu3 %v2417_v17  ;;  %v2184_v17 = vld [vmem:[#allocation8 + $0xb8] sm:$0xff] }
  0xe8   :  { %1366 = vmatpush.bf16.msra.mxu0 %v2166_v32  ;;  %1390 = vmatpush.bf16.msra.mxu2 %v2184_v17 }
  0xea   :  { %1379 = vmatpush.bf16.msra.mxu1 %v2174_v37 }
  0xec   :  { %1367 = vmatpush.bf16.msra.mxu0 %v2165_v33  ;;  %1391 = vmatpush.bf16.msra.mxu2 %v2183_v41 }
  0xee   :  { %1380 = vmatpush.bf16.msra.mxu1 %v2173_v39 }
  0xf0   :  { %1368 = vmatpush.bf16.msra.mxu0 %v2164_v35  ;;  %1392 = vmatpush.bf16.msra.mxu2 %v2182_v43 }
  0xf2   :  { %1381 = vmatpush.bf16.msra.mxu1 %v2172_v11 }
  0xf4   :  { %1369 = vmatpush.bf16.msra.mxu0 %v2163_v36  ;;  %1393 = vmatpush.bf16.msra.mxu2 %v2181_v50 }
  0xf6   :  { %1382 = vmatpush.bf16.msra.mxu1 %v2171_v40 }
  0xf8   :  { %1370 = vmatpush.bf16.msra.mxu0 %v2162_v53  ;;  %1394 = vmatpush.bf16.msra.mxu2 %v2180_v52 }
  0xfa   :  { %1383 = vmatpush.bf16.msra.mxu1 %v2170_v42 }
  0xfc   :  { %1371 = vmatpush.bf16.msra.mxu0 %v2161_v38  ;;  %1395 = vmatpush.bf16.msra.mxu2 %v2179_v57  ;;  %v2197_v38 = vld [vmem:[#allocation10 + $0x7] ss:$0 sm:$0xff] }
  0xfe   :  { %1384 = vmatpush.bf16.msra.mxu1 %v2169_v49 }
 0x100   :  { %1396 = vmatpush.bf16.msra.mxu2 %v2178_v61 }
 0x104   :  { %1397 = vmatpush.bf16.msra.mxu2 %v2177_v2 }
 0x13b   :  { %v1016_v45 = vpop.f32.mrf.mxu0 }
 0x13c   :  { %v1029_v46 = vpop.f32.mrf.mxu1  ;;  %v1017_v51 = vadd.f32 %v1016_v45, %v489_v47 }
 0x13e   :  { %v1030_v56 = vadd.f32 %v1029_v46, %v1017_v51 }
 0x143   :  { %v1018_v54 = vpop.f32.mrf.mxu0 }
 0x144   :  { %v1031_v55 = vpop.f32.mrf.mxu1 }
 0x149   :  { %v1042_v58 = vpop.f32.mrf.mxu2 }
 0x14a   :  { %v1043_v59 = vadd.f32 %v1042_v58, %v1030_v56  ;;  %v1055_v60 = vpop.f32.mrf.mxu3 }
 0x14b   :  { %v1068_v63 = vpop.f32.mrf.mxu0 }
 0x14c   :  { %v1056_v62 = vadd.f32 %v1055_v60, %v1043_v59  ;;  %v1081_v0 = vpop.f32.mrf.mxu1  ;;  %v1069_v7 = vadd.f32 %v1068_v63, %v490_v4 }
 0x14e   :  { %v1163_v1 = vmax.f32 %v1056_v62, 0.0  ;;  %v1082_v10 = vadd.f32 %v1081_v0, %v1069_v7 }
 0x150   :  { %v1166_v3 = vpack.c.bf16 %v1163_v1, %v1163_v1 }
 0x151   :  { %v1044_v5 = vpop.f32.mrf.mxu2 }
 0x152   :  { %v1057_v6 = vpop.f32.mrf.mxu3  ;;  %1372 = vmatmul.bf16.vlgmr.msra.gmra.mxu0 %v1166_v3 }
 0x153   :  { %v1070_v8 = vpop.f32.mrf.mxu0 }
 0x154   :  { %v1083_v9 = vpop.f32.mrf.mxu1 }
 0x159   :  { %v1094_v12 = vpop.f32.mrf.mxu2 }
 0x15a   :  { %v1095_v13 = vadd.f32 %v1094_v12, %v1082_v10  ;;  %v1107_v14 = vpop.f32.mrf.mxu3 }
 0x15c   :  { %v1108_v15 = vadd.f32 %v1107_v14, %v1095_v13  ;;  %v1120_v16 = vpop.f32.mrf.mxu0 }
 0x15d   :  { %v1121_v24 = vadd.f32 %v1120_v16, %v491_v21 }
 0x15e   :  { %v1164_v18 = vmax.f32 %v1108_v15, 0.0  ;;  %v1133_v19 = vpop.f32.mrf.mxu1 }
 0x15f   :  { %v1134_v27 = vadd.f32 %v1133_v19, %v1121_v24 }
 0x160   :  { %v1167_v20 = vpack.c.bf16 %v1164_v18, %v1164_v18 }
 0x161   :  { %v1096_v22 = vpop.f32.mrf.mxu2 }
 0x162   :  { %v1109_v23 = vpop.f32.mrf.mxu3  ;;  %1385 = vmatmul.bf16.vlgmr.msra.gmra.mxu1 %v1167_v20 }
 0x164   :  { %v1122_v25 = vpop.f32.mrf.mxu0 }
 0x166   :  { %v1135_v26 = vpop.f32.mrf.mxu1 }
 0x169   :  { %v1146_v28 = vpop.f32.mrf.mxu2 }
 0x16a   :  { %v1147_v29 = vadd.f32 %v1146_v28, %v1134_v27  ;;  %v1159_v30 = vpop.f32.mrf.mxu3 }
 0x16c   :  { %v1160_v31 = vadd.f32 %v1159_v30, %v1147_v29 }
 0x16e   :  { %v1165_v32 = vmax.f32 %v1160_v31, 0.0 }
 0x170   :  { %v1168_v33 = vpack.c.bf16 %v1165_v32, %v1165_v32 }
 0x171   :  { %v1148_v34 = vpop.f32.mrf.mxu2 }
 0x172   :  { %v1161_v35 = vpop.f32.mrf.mxu3  ;;  %1398 = vmatmul.bf16.vlgmr.msra.gmra.mxu2 %v1168_v33 }
 0x1cf   :  { %v1373_v36 = vpop.f32.mrf.mxu0 }
 0x1d0   :  { %v1374_v39 = vadd.f32 %v2197_v38, %v1373_v36 }
 0x1d7   :  { %v1375_v48 = vpop.f32.mrf.mxu0 }
 0x1df   :  { %v1386_v53 = vpop.f32.mrf.mxu1 }
 0x1e0   :  { %v1387_v11 = vadd.f32 %v1386_v53, %v1374_v39 }
 0x1e7   :  { %v1388_v37 = vpop.f32.mrf.mxu1 }
 0x1f5   :  { %v1399_v17 = vpop.f32.mrf.mxu2 }
 0x1f6   :  { %v1400_v40 = vadd.f32 %v1399_v17, %v1387_v11 }
 0x1f8   :  { %2198 = vtanh.f32 %v1400_v40 }
 0x1fd   :  { %v1401_v41 = vpop.f32.mrf.mxu2 }
 0x1fe   :  { %v2199_v42 = vpop.eup %2198 }
 0x1ff   :  { %v1404_v43 = vmul.f32 2.0, %v2199_v42 }
 0x201   :  { %1405 = vst [vmem:[#allocation11] sm:$0xff] %v1404_v43 }
 0x202   :  { %1416 = dma.vmem_to_hbm [thread:$0]  %s1412_s4, 128, %s1414_s23, [#allocation4]  }
 0x203   :  { %2350 = dma.done.wait [#allocation4], 128  }
 0x204   :  { %2351 = vsyncadd [#allocation4], 4294967168 }
 0x205   :  { %1421 = vsyncpa [#allocation3], 1 }
 0x206   :  { %1422 = vsyncpa [#allocation6], 1 }
 0x207   :  { %1423 = vsyncpa [#allocation9], 1 }
 0x208   :  { %1424 = vsyncpa [#allocation4], 1 }

</bundles_post_ra>
